<compile_context>
chip_gen: v5e
topology: v5e:2x2
jax: 0.10.0
libtpu: 0.0.40
codegen_flags: <defaults>
</compile_context>

<pallas_src>
import functools

import jax
import jax.numpy as jnp
from jax.experimental import pallas as pl
from jax.experimental.pallas import tpu as pltpu

_MIB = 1024 * 1024
_LANE = 128
_ROW_TILE_CAP = 512      # ~85% of HBM roofline already at 512-wide f32 tiles
_TARGET_STEPS = 8        # >= 4 grid steps per TensorCore on v7x (2 TCs)


def _layernorm_kernel(x_ref, w_ref, b_ref, o_ref, *, eps, hidden_true, masked):
    # x_ref: (row_tile, hidden_pad); w_ref/b_ref: (1, hidden_pad)
    x = x_ref[...].astype(jnp.float32)
    inv_h = jnp.float32(1.0 / hidden_true)

    # Two-pass mean/variance in f32 (matches F.layer_norm numerics).
    # Padded lanes (if any) are exact zeros -> contribute nothing to sum(x).
    mean = jnp.sum(x, axis=-1, keepdims=True) * inv_h
    d = x - mean
    if masked:
        # Mask padded lanes out of the squared-deviation sum.
        col = jax.lax.broadcasted_iota(jnp.int32, x.shape, dimension=1)
        d = jnp.where(col < hidden_true, d, 0.0)
    var = jnp.sum(d * d, axis=-1, keepdims=True) * inv_h
    inv = jax.lax.rsqrt(var + eps)

    y = d * inv * w_ref[...].astype(jnp.float32)
    if b_ref is not None:
        y = y + b_ref[...].astype(jnp.float32)
    o_ref[...] = y.astype(o_ref.dtype)


def _vmem_capacity_bytes():
    try:
        return int(pltpu.get_tpu_info().vmem_capacity_bytes)
    except Exception:
        return 64 * _MIB  # conservative: v7x has the smallest VMEM (64 MiB)


def _sublane_multiple(dtype):
    # 8 rows for 4-byte dtypes, 16 for bf16/f16, 32 for int8/fp8.
    return max(8, 32 // jnp.dtype(dtype).itemsize)


def _per_row_bytes(hidden_pad, x_dtype, out_dtype):
    xi = jnp.dtype(x_dtype).itemsize
    oi = jnp.dtype(out_dtype).itemsize
    # double-buffered input + output blocks, plus ~3 tile-sized f32
    # intermediates (x_f32, d, y) that are not double-buffered.
    return hidden_pad * (2 * xi + 2 * oi + 3 * 4)


def _pick_row_tile(rows, hidden_pad, x_dtype, out_dtype):
    sub = _sublane_multiple(x_dtype)
    rows_aligned = ((rows + sub - 1) // sub) * sub

    # Conservative VMEM fraction so v7x (64 MiB) keeps headroom for Mosaic
    # scratch and the un-double-buffered f32 intermediates.
    budget = int(_vmem_capacity_bytes() * 0.4)
    per_row = _per_row_bytes(hidden_pad, x_dtype, out_dtype)
    by_vmem = max(sub, (budget // max(per_row, 1)) // sub * sub)

    # Require >= _TARGET_STEPS grid steps when the row count allows it, so the
    # pipeline double-buffers and both v7x TCs get work.
    by_steps = -(-rows_aligned // _TARGET_STEPS)  # ceil
    by_steps = max(sub, ((by_steps + sub - 1) // sub) * sub)

    row_tile = min(_ROW_TILE_CAP, by_vmem, by_steps, rows_aligned)
    row_tile = max(sub, (row_tile // sub) * sub)
    return row_tile


def _vmem_limit_bytes(row_tile, hidden_pad, x_dtype, out_dtype):
    est = row_tile * _per_row_bytes(hidden_pad, x_dtype, out_dtype) + 4 * hidden_pad * 4
    cap = int(_vmem_capacity_bytes() * 0.6)   # ~38 MiB on v7x, ~76 MiB on v5e/v6e
    return min(cap, max(32 * _MIB, est + 8 * _MIB))


def layer_norm(x, weight, bias=None, *, eps=1e-5, row_tile=None):
    """LayerNorm over the last axis of x (matches F.layer_norm semantics)."""
    orig_shape = x.shape
    hidden = orig_shape[-1]
    x2 = x.reshape(-1, hidden)
    rows = x2.shape[0]
    out_dtype = x.dtype

    # Lane-dense path: pad hidden to a multiple of 128 so output stores are
    # full-width. Zero padding is exact for the mean; the kernel masks padded
    # lanes out of the variance; output is sliced back below.
    hidden_pad = ((hidden + _LANE - 1) // _LANE) * _LANE
    masked = hidden_pad != hidden
    if masked:
        pad = hidden_pad - hidden
        x2 = jnp.pad(x2, ((0, 0), (0, pad)))
        w2 = jnp.pad(weight.reshape(1, hidden), ((0, 0), (0, pad)))
        b2 = (jnp.pad(bias.reshape(1, hidden), ((0, 0), (0, pad)))
              if bias is not None else None)
    else:
        w2 = weight.reshape(1, hidden)
        b2 = bias.reshape(1, hidden) if bias is not None else None

    if row_tile is None:
        row_tile = _pick_row_tile(rows, hidden_pad, x2.dtype, out_dtype)

    # Partial tail row-block is handled by Pallas (masked writes); padded-row
    # reads compute garbage that is discarded.
    grid = (pl.cdiv(rows, row_tile),)

    x_spec = pl.BlockSpec((row_tile, hidden_pad), lambda i: (i, 0))
    p_spec = pl.BlockSpec((1, hidden_pad), lambda i: (0, 0))
    out_spec = pl.BlockSpec((row_tile, hidden_pad), lambda i: (i, 0))

    if b2 is not None:
        kernel = functools.partial(
            _layernorm_kernel, eps=eps, hidden_true=hidden, masked=masked)
        in_specs = [x_spec, p_spec, p_spec]
        args = (x2, w2, b2)
    else:
        def kernel(x_ref, w_ref, o_ref):
            _layernorm_kernel(x_ref, w_ref, None, o_ref,
                              eps=eps, hidden_true=hidden, masked=masked)
        in_specs = [x_spec, p_spec]
        args = (x2, w2)

    out = pl.pallas_call(
        kernel,
        out_shape=jax.ShapeDtypeStruct((rows, hidden_pad), out_dtype),
        grid_spec=pltpu.PrefetchScalarGridSpec(
            num_scalar_prefetch=0,
            grid=grid,
            in_specs=in_specs,
            out_specs=out_spec,
        ),
        compiler_params=pltpu.CompilerParams(
            dimension_semantics=("parallel",),
            vmem_limit_bytes=_vmem_limit_bytes(row_tile, hidden_pad, x2.dtype, out_dtype),
        ),
    )(*args)

    if masked:
        out = out[:, :hidden]
    return out.reshape(orig_shape)


def _ref_layer_norm(x, weight, bias, eps=1e-5):
    mean = jnp.mean(x, axis=-1, keepdims=True)
    var = jnp.mean((x - mean) ** 2, axis=-1, keepdims=True)
    y = (x - mean) / jnp.sqrt(var + eps) * weight
    if bias is not None:
        y = y + bias
    return y


if __name__ == "__main__":
    key = jax.random.PRNGKey(0)
    B, T, C = 2, 8, 32  # (batch, seq, hidden); normalize over hidden
    # NOTE: C=32 exercises the pad-to-128 lane-dense path; real GPT hidden
    # sizes (multiples of 128) skip the pad entirely.

    x = jax.random.normal(key, (B, T, C), dtype=jnp.float32)

    # Deterministic parameter init matching nn.Module __init__:
    # weight = ones(ndim), bias = zeros(ndim) (bias=True variant).
    weight = jnp.ones((C,), dtype=jnp.float32)
    bias = jnp.zeros((C,), dtype=jnp.float32)

    # bias=True path
    y = jax.block_until_ready(layer_norm(x, weight, bias, eps=1e-5))
    # bias=False path (module with bias=None)
    y_nb = jax.block_until_ready(layer_norm(x, weight, None, eps=1e-5))

    ref = _ref_layer_norm(x, weight, bias, 1e-5)
    assert jnp.allclose(y, ref, atol=1e-4, rtol=1e-4)
    assert jnp.allclose(y_nb, ref, atol=1e-4, rtol=1e-4)

    # Partial-tail-block path (rows=15 not a multiple of 8).
    x_odd = jax.random.normal(jax.random.PRNGKey(1), (3, 5, C), dtype=jnp.float32)
    y_odd = jax.block_until_ready(layer_norm(x_odd, weight, bias, eps=1e-5))
    ref_odd = _ref_layer_norm(x_odd, weight, bias, 1e-5)
    assert jnp.allclose(y_odd, ref_odd, atol=1e-4, rtol=1e-4)

    # Lane-dense (no padding) path: hidden already a multiple of 128.
    C2 = 128
    x_ld = jax.random.normal(jax.random.PRNGKey(2), (2, 8, C2), dtype=jnp.float32)
    w_ld = jnp.ones((C2,), dtype=jnp.float32)
    b_ld = jnp.zeros((C2,), dtype=jnp.float32)
    y_ld = jax.block_until_ready(layer_norm(x_ld, w_ld, b_ld, eps=1e-5))
    ref_ld = _ref_layer_norm(x_ld, w_ld, b_ld, 1e-5)
    assert jnp.allclose(y_ld, ref_ld, atol=1e-4, rtol=1e-4)

    print("KERNEL_OK")
</pallas_src>

<mosaic_0001>
module attributes {stable_mosaic.version = 11 : i64} {
  func.func @_layernorm_kernel(%arg0: i32, %arg1: memref<8x128xf32, #tpu.memory_space<vmem>>, %arg2: memref<1x128xf32, #tpu.memory_space<vmem>>, %arg3: memref<1x128xf32, #tpu.memory_space<vmem>>, %arg4: memref<8x128xf32, #tpu.memory_space<vmem>>) attributes {dimension_semantics = [#tpu.dimension_semantics<parallel>], iteration_bounds = array<i64: 2>, scalar_prefetch = 0 : i64, scratch_operands = 0 : i64, tpu.core_type = #tpu.core_type<tc>, window_params = [{transform_indices = @transform_0, window_bounds = array<i64: 8, 128>}, {pipeline_mode = #tpu.pipeline_mode<synchronous>, transform_indices = @transform_1, window_bounds = array<i64: 1, 128>}, {pipeline_mode = #tpu.pipeline_mode<synchronous>, transform_indices = @transform_2, window_bounds = array<i64: 1, 128>}, {transform_indices = @transform_3, window_bounds = array<i64: 8, 128>}]} {
    %c0 = arith.constant 0 : index
    %c0_0 = arith.constant 0 : index
    %0 = vector.load %arg1[%c0, %c0_0] : memref<8x128xf32, #tpu.memory_space<vmem>>, vector<8x128xf32>
    %cst = arith.constant dense<0.000000e+00> : vector<8xf32>
    %1 = vector.multi_reduction <add>, %0, %cst [1] : vector<8x128xf32> to vector<8xf32>
    %2 = vector.shape_cast %1 : vector<8xf32> to vector<8x1xf32>
    %cst_1 = arith.constant 3.125000e-02 : f32
    %3 = vector.broadcast %cst_1 : f32 to vector<8x1xf32>
    %4 = arith.mulf %2, %3 : vector<8x1xf32>
    %5 = vector.broadcast %4 : vector<8x1xf32> to vector<8x128xf32>
    %6 = arith.subf %0, %5 : vector<8x128xf32>
    %7 = tpu.iota {dimensions = array<i32: 1>} : vector<8x128xi32>
    %c32_i32 = arith.constant 32 : i32
    %8 = vector.broadcast %c32_i32 : i32 to vector<8x128xi32>
    %9 = arith.cmpi slt, %7, %8 : vector<8x128xi32>
    %cst_2 = arith.constant 0.000000e+00 : f32
    %10 = vector.broadcast %cst_2 : f32 to vector<8x128xf32>
    %11 = arith.select %9, %6, %10 : vector<8x128xi1>, vector<8x128xf32>
    %12 = arith.mulf %11, %11 : vector<8x128xf32>
    %cst_3 = arith.constant dense<0.000000e+00> : vector<8xf32>
    %13 = vector.multi_reduction <add>, %12, %cst_3 [1] : vector<8x128xf32> to vector<8xf32>
    %14 = vector.shape_cast %13 : vector<8xf32> to vector<8x1xf32>
    %cst_4 = arith.constant 3.125000e-02 : f32
    %15 = vector.broadcast %cst_4 : f32 to vector<8x1xf32>
    %16 = arith.mulf %14, %15 : vector<8x1xf32>
    %cst_5 = arith.constant 9.99999974E-6 : f32
    %17 = vector.broadcast %cst_5 : f32 to vector<8x1xf32>
    %18 = arith.addf %16, %17 : vector<8x1xf32>
    %19 = math.rsqrt %18 : vector<8x1xf32>
    %20 = vector.broadcast %19 : vector<8x1xf32> to vector<8x128xf32>
    %21 = arith.mulf %11, %20 : vector<8x128xf32>
    %c0_6 = arith.constant 0 : index
    %c0_7 = arith.constant 0 : index
    %22 = vector.load %arg2[%c0_6, %c0_7] : memref<1x128xf32, #tpu.memory_space<vmem>>, vector<1x128xf32>
    %23 = vector.broadcast %22 : vector<1x128xf32> to vector<8x128xf32>
    %24 = arith.mulf %21, %23 : vector<8x128xf32>
    %c0_8 = arith.constant 0 : index
    %c0_9 = arith.constant 0 : index
    %25 = vector.load %arg3[%c0_8, %c0_9] : memref<1x128xf32, #tpu.memory_space<vmem>>, vector<1x128xf32>
    %26 = vector.broadcast %25 : vector<1x128xf32> to vector<8x128xf32>
    %27 = arith.addf %24, %26 : vector<8x128xf32>
    %c0_10 = arith.constant 0 : index
    %c0_11 = arith.constant 0 : index
    %28 = vector.load %arg4[%c0_10, %c0_11] : memref<8x128xf32, #tpu.memory_space<vmem>>, vector<8x128xf32>
    tpu.vector_store %arg4[%c0_10, %c0_11], %27 {strides = array<i32>} : memref<8x128xf32, #tpu.memory_space<vmem>>, vector<8x128xf32>,
    return
  }
  func.func @transform_0(%arg0: i32) -> (i32, i32) {
    %c0_i32 = arith.constant 0 : i32
    %c0_i32_0 = arith.constant 0 : i32
    return %arg0, %c0_i32 : i32, i32
  }
  func.func @transform_1(%arg0: i32) -> (i32, i32) {
    %c0_i32 = arith.constant 0 : i32
    %c0_i32_0 = arith.constant 0 : i32
    %c0_i32_1 = arith.constant 0 : i32
    return %c0_i32, %c0_i32_0 : i32, i32
  }
  func.func @transform_2(%arg0: i32) -> (i32, i32) {
    %c0_i32 = arith.constant 0 : i32
    %c0_i32_0 = arith.constant 0 : i32
    %c0_i32_1 = arith.constant 0 : i32
    return %c0_i32, %c0_i32_0 : i32, i32
  }
  func.func @transform_3(%arg0: i32) -> (i32, i32) {
    %c0_i32 = arith.constant 0 : i32
    %c0_i32_0 = arith.constant 0 : i32
    return %arg0, %c0_i32 : i32, i32
  }
}

</mosaic_0001>

<bundles_post_ra>
// kernel: tpu_custom_call.1
= control target key start
LH: loop header
LB: loop body
LE: loop exit
PB: predicated region body
PF: predicated region fallthrough
CT: control target
= control target key end

     0   :  { %8 = vsyncpa [#allocation3], 0  ;;  %s708_s0 = inlined_call_operand.hbm [shape: f32[16,128], index: 0, kind: input, shape index: {}]   ;;  %s709_s1 = inlined_call_operand.hbm [shape: f32[1,128], index: 1, kind: input, shape index: {}]   ;;  %s710_s2 = inlined_call_operand.vmem [shape: f32[1,128], index: 2, kind: input, shape index: {}]   ;;  %s711_s3 = inlined_call_operand.hbm [shape: f32[16,128], index: 3, kind: output, shape index: {}]  }
   0x1   :  { %10 = vsyncpa [#allocation3 + $0x1], 0 }
   0x2   :  { %11 = vsyncpa [#allocation6], 0 }
   0x3   :  { %12 = vsyncpa [#allocation4], 0 }
   0x4   :  { %14 = vsyncpa [#allocation4 + $0x1], 0  ;;  %s563_s12 = smov 0   ;;  %s565_s13 = smov 0  }
   0x5   :  { %s567_s14 = smov 0   ;;  %s569_s15 = smov 0  }
   0x6 LB: > { %s584_s16 = sadd.s32 4294967295, %s540_s15   ;;  %s335_s17 = sadd.s32 4294967294, %s540_s15   ;;  %s540_s15 = sphi %s569_s15, %s721_s15   ;;  %s536_s14 = sphi %s567_s14, %s720_s14   ;;  %s532_s13 = sphi %s565_s13, %s719_s13   ;;  %s528_s12 = sphi %s563_s12, %s718_s12  }
   0x7   : > { %p40_p0 = scmp.ne.s32.totalorder %s532_s13, %s528_s12  ;;  %p41_p1 = scmp.eq.s32.totalorder %s584_s16, 0 }
   0x8   : > { %p106_p2 = scmp.eq.s32.totalorder %s584_s16, 1  ;;  %p112_p3 = scmp.eq.s32.totalorder %s335_s17, 1 }
   0x9   : > { %p593_p4 = por %p41_p1, %p40_p0  ;;  %p336_p5 = scmp.ge.s32.totalorder %s540_s15, 1 }
   0xa   : > { %p598_p6 = por %p112_p3, %p40_p0  ;;  %p119_p7 = scmp.lt.s32.totalorder %s540_s15, 3 }
   0xb   : > { %s131_s22 = sshll.u32 %s709_s1, 4  ;;  %s542_s24 = smov [#allocation5]   ;;  %s132_s22 = int_to_ptr.hbm [resolvable:$true] %s131_s22 }
   0xc   : > { %p606_p8 = pnand %p336_p5, %p119_p7  ;;  %s133_s25 = sshll.u32 %s542_s24, 4  ;;  %s134_s25 = int_to_ptr.vmem [resolvable:$true] %s133_s25 }
   0xd   : > { %s616_s26 = sadd.s32 1, %s540_s15   ;;  %s27_s27 = sadd.s32 1, %s536_s14 }
   0xe   : > { %p357_p10 = pneg %p606_p8  ;;  %s24_s28 = ssub.s32 %s540_s15, %s616_s26 }
   0xf   : > { %p25_p12 = scmp.eq.s32.totalorder %s24_s28, 0  ;;  %p34_p13 = scmp.ne.s32.totalorder %s536_s14, %s532_s13 }
  0x10   : > { %p358_p11 = pnand %p357_p10, %p41_p1  ;;  %p35_p0 = scmp.eq.s32.totalorder %s540_s15, 0 }
  0x11   : > { %s625_s29 = scalar_select %p25_p12, %s536_s14, %s27_s27  }
  0x12   : > { %360 = dma.hbm_to_vmem [thread:$0]  (!%p358_p11), %s132_s22, 16, %s134_s25, [#allocation6]  }
  0x13   : > { %p629_p3 = por %p106_p2, %p34_p13  ;;  %p370_p5 = scmp.lt.s32.totalorder %s540_s15, 2 }
  0x14   : > { %s147_s4 = sand.u32 1, %s536_s14   ;;  %s340_s5 = sshll.u32 %s540_s15, 3 }
  0x15   : > { %p36_p7 = por %p35_p0, %p34_p13  ;;  %s339_s6 = sshll.u32 %s147_s4, 3 }
  0x16   : > { %s155_s9 = scalar_lea.hbm %s708_s0, %s340_s5  ;;  %s151_s11 = scalar_lea.vmem [#allocation2], %s339_s6 }
  0x17   : > { %s157_s10 = sshll.u32 %s155_s9, 4  ;;  %s159_s17 = sshll.u32 %s151_s11, 4  ;;  %s158_s10 = int_to_ptr.hbm [resolvable:$true] %s157_s10  ;;  %s160_s17 = int_to_ptr.vmem [resolvable:$true] %s159_s17 }
  0x18   : > { %p639_p10 = pnand %p370_p5, %p36_p7  ;;  %s148_s21 = scalar_lea.sflag [#allocation3], %s147_s4 }
  0x19   : > { %s440_s22 = sshra.s32 %s158_s10, 4  ;;  %s447_s28 = scalar_lea.hbm %s708_s0, 16  ;;  %s441_s22 = int_to_ptr.hbm [resolvable:$true] %s440_s22 }
  0x1a   : > { %s442_s24 = scalar_lea.hbm %s441_s22, 8  ;;  %p444_p11 = pneg %p639_p10 }
  0x1b   : > { %p443_p2 = scmp.ne.s32.totalorder %s441_s22, %s442_s24  ;;  %p448_p0 = scmp.lt.s32.totalorder %s441_s22, %s708_s0 }
  0x1c   : > { %p449_p5 = scmp.lt.s32.totalorder %s447_s28, %s442_s24 }
  0x1d   : > { %p445_p12 = pnand %p444_p11, %p443_p2 }
  0x1e   : > { %p450_p7 = por %p449_p5, %p448_p0 }
  0x1f   : > { %p446_p13 = pneg %p445_p12 }
  0x21   : > { %p451_p9 = pnand %p450_p7, %p446_p13 }
  0x23   : > { %454 = shalt.err (!%p451_p9)
}
  0x24   : > { %364 = dma.hbm_to_vmem [thread:$0]  (!%p639_p10), %s158_s10, 128, %s160_s17, %s148_s21  }
  0x25   : > { %168 = sbr.rel (%p606_p8) target bundleno = 316 (0x13c), region = 32  ;;  %s656_s4 = sand.u32 (!%p606_p8), 1, %s532_s13  }
  0x26   : > { %s342_s7 = sshll.u32 (!%p606_p8), %s656_s4, 3  ;;  %s171_s8 = scalar_lea.sflag (!%p606_p8), [#allocation3], %s656_s4 }
  0x27   : > { %s174_s9 = scalar_lea.vmem (!%p606_p8), [#allocation2], %s342_s7 }
  0x2a   : > { %515 = dma.done.wait (%p593_p4), %s171_s8, 128  }
  0x2b   : > { %517 = vsyncadd (%p593_p4), %s171_s8, 4294967168 }
  0x2c   : > { %519 = dma.done.wait (%p41_p1), [#allocation6], 16  }
  0x2d   : > { %521 = vsyncadd (%p41_p1), [#allocation6], 4294967280  ;;  %v203_v0 = vld [vmem:[%s174_s9] sm:$0xff]  ;;  %v208_v1 = vlaneseq  ;;  %s346_s18 = sshll.u32 %s584_s16, 3  ;;  %v406_v17 = vld [vmem:[#allocation5] ss:$0 sm:$0xff] }
  0x2e   : > { %204 = vadd.xlane.f32.xlu0 %v203_v0  ;;  %s250_s11 = scalar_lea.hbm %s711_s3, %s346_s18  ;;  %v407_v20 = vld [vmem:[%s710_s2] ss:$0 sm:$0xff]  ;;  %s202_s21 = scalar_lea.vmem [#allocation7], %s342_s7 }
  0x2f   : > { %v209_v2 = vand.u32 127, %v208_v1  ;;  %s252_s22 = sshll.u32 %s202_s21, 4  ;;  %s254_s16 = sshll.u32 %s250_s11, 4  ;;  %s253_s22 = int_to_ptr.vmem [resolvable:$true] %s252_s22  ;;  %s255_s16 = int_to_ptr.hbm [resolvable:$true] %s254_s16 }
  0x30   : > { %s240_s24 = scalar_lea.sflag [#allocation4], %s656_s4  ;;  %s484_s25 = sshra.s32 %s255_s16, 4  ;;  %s485_s25 = int_to_ptr.hbm [resolvable:$true] %s484_s25 }
  0x31   : > { %vm210_vm0 = vcmp.lt.s32.totalorder %v209_v2, 32  ;;  %s486_s27 = scalar_lea.hbm %s485_s25, 8  ;;  %s490_s6 = scalar_lea.hbm %s711_s3, 16 }
  0x32   : > { %p487_p1 = scmp.ne.s32.totalorder %s485_s25, %s486_s27  ;;  %p491_p9 = scmp.lt.s32.totalorder %s485_s25, %s711_s3 }
  0x33   : > { %p492_p10 = scmp.lt.s32.totalorder %s490_s6, %s486_s27 }
  0x34   : > { %p488_p4 = pnand %p487_p1, %p629_p3 }
  0x35   : > { %p493_p2 = por %p492_p10, %p491_p9 }
  0x36   : > { %p489_p8 = pneg %p488_p4 }
  0x38   : > { %p494_p11 = pnand %p493_p2, %p489_p8 }
  0xa1   : > { %v205_v3 = vpop.xlane.xlu0 %204 }
  0xa2   : > { %v206_v4 = vmul.f32 0.03125, %v205_v3 }
  0xa4   : > { %v207_v5 = vsub.f32 %v203_v0, %v206_v4 }
  0xa6   : > { %v211_v6 = vsel %vm210_vm0, %v207_v5, 0.0 }
  0xa7   : > { %v212_v7 = vmul.f32 %v211_v6, %v211_v6 }
  0xa9   : > { %213 = vadd.xlane.f32.xlu0 %v212_v7 }
 0x11c   : > { %v214_v8 = vpop.xlane.xlu0 %213 }
 0x11d   : > { %v215_v9 = vmul.f32 0.03125, %v214_v8 }
 0x11f   : > { %v216_v10 = vadd.f32 1e-05, %v215_v9 }
 0x121   : > { %408 = vrsqrt.f32 %v216_v10  ;;  %vm223_vm2 = vweird.f32 %v216_v10 }
 0x127   : > { %v409_v11 = vpop.eup %408 }
 0x128   : > { %v218_v12 = vmul.f32 %v409_v11, %v216_v10  ;;  %vm224_vm1 = vweird.f32 %v409_v11 }
 0x129   : > { %vm225_vm3 = vmor %vm223_vm2, %vm224_vm1 }
 0x12a   : > { %v219_v13 = vmul.f32 %v409_v11, %v218_v12 }
 0x12c   : > { %v220_v14 = vmul.f32 0.5, %v219_v13 }
 0x12e   : > { %v221_v15 = vsub.f32 1.5, %v220_v14 }
 0x130   : > { %v222_v16 = vmul.f32 %v409_v11, %v221_v15 }
 0x132   : > { %v226_v18 = vsel %vm225_vm3, %v409_v11, %v222_v16 }
 0x133   : > { %v227_v19 = vmul.f32 %v226_v18, %v211_v6 }
 0x135   : > { %v232_v21 = vmul.f32 %v406_v17, %v227_v19 }
 0x137   : > { %v237_v22 = vadd.f32 %v407_v20, %v232_v21 }
 0x139   : > { %238 = vst [vmem:[%s202_s21] sm:$0xff] %v237_v22 }
 0x13a   : > { %497 = shalt.err (!%p494_p11)
}
 0x13b   : > { %355 = dma.vmem_to_hbm [thread:$0]  (%p629_p3), %s253_s22, 128, %s255_s16, %s240_s24  }
 0x13c PF: > { %s266_s4 = sand.u32 1, %s528_s12   ;;  %p717_p12 = scmp.ge.s32.totalorder %s540_s15, 2 }
 0x13d   : > { %s267_s9 = scalar_lea.sflag [#allocation4], %s266_s4 }
 0x13e   : > { %p366_p13 = pnand %p717_p12, %p598_p6 }
 0x140   : > { %p367_p0 = pneg %p366_p13 }
 0x142   : > { %523 = dma.done.wait (%p367_p0), %s267_s9, 128  }
 0x143   : > { %525 = vsyncadd (%p367_p0), %s267_s9, 4294967168  ;;  %p17_p5 = scmp.ge.s32.totalorder %s616_s26, 4   ;;  %s718_s12 = smov %s532_s13 }
 0x144   : > { %s719_s13 = smov %s536_s14  ;;  %s720_s14 = smov %s625_s29 }
 0x145   : > { %s721_s15 = smov %s616_s26  ;;  %19 = sbr.rel (!%p17_p5) target bundleno = 6 (0x6), region = 81 }
 0x14a   :  { %273 = vsyncpa [#allocation3], 1 }
 0x14b   :  { %275 = vsyncpa [#allocation3 + $0x1], 1 }
 0x14c   :  { %276 = vsyncpa [#allocation6], 1 }
 0x14d   :  { %277 = vsyncpa [#allocation4], 1 }
 0x14e   :  { %279 = vsyncpa [#allocation4 + $0x1], 1 }

</bundles_post_ra>
